<compile_context>
chip_gen: v7x
topology: tpu7x:2x2x1
jax: 0.10.0
libtpu: 0.0.40
codegen_flags: <defaults>
</compile_context>

<pallas_src>
import jax
import jax.numpy as jnp
from jax.experimental import pallas as pl
from jax.experimental.pallas import tpu as pltpu


def logvar_kernel(logvar_ref, o_ref):
    # Write-only splat of the resident (1, D) parameter row over the (tb, D)
    # output tile. No input stream, no cast, no VPU work of consequence.
    o_ref[...] = jnp.broadcast_to(logvar_ref[...], o_ref.shape)


def _sublane_multiple(itemsize: int) -> int:
    # f32 -> 8, bf16/f16 -> 16, int8/fp8 -> 32 (sub-32-bit packs along sublanes).
    return max(8, 32 // max(1, itemsize))


def _lane_fold_factor(B: int, D: int) -> int:
    # If D is not lane-dense (multiple of 128), fold k batch rows into the lane
    # axis so stores are unmasked full-width vst instead of masked vst.msk.
    if D % 128 == 0:
        return 1
    for k in range(2, 129):
        if B % k == 0 and (k * D) % 128 == 0:
            return k
    return 1


def logvar_forward(x, logvar, *, target_tile_bytes=8 * 1024 * 1024):
    """Broadcast logvar (1, D) over the batch of x (B, D).

    Only x.shape / x.dtype are used; x itself is never DMA'd into the kernel.
    Output dtype follows PyTorch promotion of (zeros_like(x) + logvar).
    """
    B, D = x.shape
    assert logvar.shape == (1, D), f"logvar must be (1, {D}), got {logvar.shape}"

    out_dtype = jnp.promote_types(x.dtype, logvar.dtype)
    logvar = logvar.astype(out_dtype)
    itemsize = jnp.dtype(out_dtype).itemsize
    sub = _sublane_multiple(itemsize)

    # Lane-dense folding (no-op when D is already a multiple of 128).
    k = _lane_fold_factor(B, D)
    B_eff, D_eff = B // k, D * k
    logvar_eff = jnp.tile(logvar, (1, k)) if k > 1 else logvar

    row_bytes = D_eff * itemsize
    total_bytes = B_eff * row_bytes

    # Bytes-based tile: ~8 MiB of output per tile amortizes per-step overhead;
    # double-buffered (16 MiB) it still fits comfortably on every generation
    # (v5e/v6e 128 MiB physical VMEM, v7x 64 MiB physical / 32 MiB scoped).
    max_rows = max(1, target_tile_bytes // row_bytes)
    tb = min(B_eff, max_rows)

    # v7x megacore: when there is enough work, force >= 2 grid tiles so both
    # TensorCores drive HBM writeback (no effect on 1-TC v5e/v6e correctness).
    if total_bytes > 4 * 1024 * 1024 and B_eff >= 2 * sub:
        tb = min(tb, (B_eff + 1) // 2)

    if tb < B_eff:
        # Respect the dtype-dependent sublane multiple on the block's sublane dim.
        tb = max(sub, (tb // sub) * sub)
    # else: tb == B_eff (full-extent block) is always a legal block shape.

    grid = (pl.cdiv(B_eff, tb),)

    # Explicit VMEM limit from the actual footprint (double-buffered output tile
    # + resident parameter row) plus headroom, independent of scoped defaults.
    vmem_needed = 2 * tb * row_bytes + 2 * row_bytes
    vmem_limit = int(min(64 * 1024 * 1024,
                         max(vmem_needed + (1 << 20), 4 * 1024 * 1024)))

    out = pl.pallas_call(
        logvar_kernel,
        out_shape=jax.ShapeDtypeStruct((B_eff, D_eff), out_dtype),
        grid_spec=pltpu.PrefetchScalarGridSpec(
            num_scalar_prefetch=0,
            grid=grid,
            in_specs=[
                pl.BlockSpec((1, D_eff), lambda i: (0, 0)),  # parameter row, resident
            ],
            out_specs=pl.BlockSpec((tb, D_eff), lambda i: (i, 0)),
        ),
        compiler_params=pltpu.CompilerParams(
            dimension_semantics=("parallel",),
            vmem_limit_bytes=vmem_limit,
        ),
    )(logvar_eff)

    return out.reshape(B, D) if k > 1 else out


if __name__ == "__main__":
    key = jax.random.PRNGKey(0)

    # Module config (deterministic, synthetic): output_dim = 128, logvar_init = -1.0
    batch, output_dim, logvar_init = 8, 128, -1.0
    x = jax.random.normal(key, (batch, output_dim), dtype=jnp.float32)
    logvar_param = jnp.full((1, output_dim), logvar_init, dtype=jnp.float32)

    out = jax.block_until_ready(logvar_forward(x, logvar_param))
    ref = jnp.zeros_like(x) + logvar_param
    assert out.shape == ref.shape and out.dtype == ref.dtype
    assert jnp.allclose(out, ref), "mismatch vs reference broadcast (D=128)"

    # Exercise the lane-dense folding path (output_dim not a multiple of 128).
    batch2, output_dim2 = 16, 64
    x2 = jax.random.normal(jax.random.PRNGKey(0), (batch2, output_dim2), dtype=jnp.float32)
    logvar_param2 = jnp.full((1, output_dim2), -0.5, dtype=jnp.float32)
    out2 = jax.block_until_ready(logvar_forward(x2, logvar_param2))
    ref2 = jnp.zeros_like(x2) + logvar_param2
    assert out2.shape == ref2.shape and out2.dtype == ref2.dtype
    assert jnp.allclose(out2, ref2), "mismatch vs reference broadcast (D=64 folded)"

    print("KERNEL_OK")
</pallas_src>

<mosaic_0001>
module attributes {stable_mosaic.version = 11 : i64} {
  func.func @logvar_kernel(%arg0: i32, %arg1: memref<1x128xf32, #tpu.memory_space<vmem>>, %arg2: memref<8x128xf32, #tpu.memory_space<vmem>>) attributes {dimension_semantics = [#tpu.dimension_semantics<parallel>], iteration_bounds = array<i64: 1>, scalar_prefetch = 0 : i64, scratch_operands = 0 : i64, tpu.core_type = #tpu.core_type<tc>, window_params = [{pipeline_mode = #tpu.pipeline_mode<synchronous>, transform_indices = @transform_0, window_bounds = array<i64: 1, 128>}, {transform_indices = @transform_1, window_bounds = array<i64: 8, 128>}]} {
    %c0 = arith.constant 0 : index
    %c0_0 = arith.constant 0 : index
    %0 = vector.load %arg1[%c0, %c0_0] : memref<1x128xf32, #tpu.memory_space<vmem>>, vector<1x128xf32>
    %1 = vector.shape_cast %0 : vector<1x128xf32> to vector<1x128xf32>
    %2 = vector.broadcast %1 : vector<1x128xf32> to vector<8x128xf32>
    %c0_1 = arith.constant 0 : index
    %c0_2 = arith.constant 0 : index
    %3 = vector.load %arg2[%c0_1, %c0_2] : memref<8x128xf32, #tpu.memory_space<vmem>>, vector<8x128xf32>
    tpu.vector_store %arg2[%c0_1, %c0_2], %2 {strides = array<i32>} : memref<8x128xf32, #tpu.memory_space<vmem>>, vector<8x128xf32>,
    return
  }
  func.func @transform_0(%arg0: i32) -> (i32, i32) {
    %c0_i32 = arith.constant 0 : i32
    %c0_i32_0 = arith.constant 0 : i32
    %c0_i32_1 = arith.constant 0 : i32
    return %c0_i32, %c0_i32_0 : i32, i32
  }
  func.func @transform_1(%arg0: i32) -> (i32, i32) {
    %c0_i32 = arith.constant 0 : i32
    %c0_i32_0 = arith.constant 0 : i32
    return %arg0, %c0_i32 : i32, i32
  }
}

</mosaic_0001>

<bundles_post_ra>
// kernel: tpu_custom_call.1
= control target key start
LH: loop header
LB: loop body
LE: loop exit
PB: predicated region body
PF: predicated region fallthrough
CT: control target
= control target key end

     0   :  { %6 = vsyncpa [#allocation3], 0  ;;  %s131_s0 = inlined_call_operand.hbm [shape: f32[1,128], index: 0, kind: input, shape index: {}]   ;;  %s132_s1 = inlined_call_operand.hbm [shape: f32[8,128], index: 1, kind: output, shape index: {}]  }
   0x1   :  { %7 = vsyncpa [#allocation4], 0  ;;  %s95_s6 = smov [#allocation2]   ;;  %s47_s10 = scalar_lea.hbm %s131_s0, 16 }
   0x2   :  { %s14_s7 = sshll.u32 %s95_s6, 4  ;;  %p48_p0 = scmp.ne.s32.totalorder %s131_s0, %s47_s10  ;;  %s15_s7 = int_to_ptr.vmem [resolvable:$true] %s14_s7 }
   0x3   :  { %p51_p1 = scmp.lt.u32.totalorder %s47_s10, %s131_s0 }
   0x5   :  { %p53_p2 = pnand %p51_p1, %p48_p0 }
   0x7   :  { %56 = shalt.err (!%p53_p2)
}
   0x8   :  { %s57_s15 = scalar_lea.vmem %s15_s7, 16  ;;  %s61_s16 = scalar_lea.vmem %s15_s7, 32 }
   0x9   :  { %p58_p3 = scmp.ne.s32.totalorder %s15_s7, %s57_s15  ;;  %p62_p4 = scmp.lt.s32.totalorder %s15_s7, %s15_s7 }
   0xa   :  { %p63_p5 = scmp.lt.s32.totalorder %s61_s16, %s57_s15 }
   0xc   :  { %p64_p6 = por %p63_p5, %p62_p4 }
   0xe   :  { %p65_p7 = pnand %p64_p6, %p58_p3 }
  0x10   :  { %68 = shalt.err (!%p65_p7)
}
  0x11   :  { %17 = dma.hbm_to_vmem [thread:$0]  %s131_s0, 16, %s15_s7, [#allocation3]  }
  0x12   :  { %91 = dma.done.wait [#allocation3], 16  }
  0x13   :  { %92 = vsyncadd [#allocation3], 4294967280  ;;  %s96_s19 = smov [#allocation5]   ;;  %v44_v0 = vld [vmem:[#allocation2] ss:$0 sm:$0xff] }
  0x14   :  { %s35_s20 = sshll.u32 %s96_s19, 4  ;;  %28 = vst [vmem:[#allocation5] sm:$0xff] %v44_v0  ;;  %s36_s20 = int_to_ptr.vmem [resolvable:$true] %s35_s20 }
  0x15   :  { %s69_s21 = scalar_lea.vmem %s36_s20, 128  ;;  %p74_p9 = scmp.lt.s32.totalorder %s36_s20, %s36_s20 }
  0x16   :  { %p70_p8 = scmp.ne.s32.totalorder %s36_s20, %s69_s21  ;;  %p75_p10 = scmp.lt.s32.totalorder %s69_s21, %s69_s21 }
  0x18   :  { %p76_p11 = por %p75_p10, %p74_p9 }
  0x1a   :  { %p77_p12 = pnand %p76_p11, %p70_p8 }
  0x1c   :  { %80 = shalt.err (!%p77_p12)
}
  0x1d   :  { %s81_s24 = scalar_lea.hbm %s132_s1, 128 }
  0x1e   :  { %p82_p13 = scmp.ne.s32.totalorder %s132_s1, %s81_s24  ;;  %p85_p0 = scmp.lt.u32.totalorder %s81_s24, %s132_s1 }
  0x20   :  { %p87_p1 = pnand %p85_p0, %p82_p13 }
  0x22   :  { %90 = shalt.err (!%p87_p1)
}
  0x23   :  { %38 = dma.vmem_to_hbm [thread:$0]  %s36_s20, 128, %s132_s1, [#allocation4]  }
  0x24   :  { %93 = dma.done.wait [#allocation4], 128  }
  0x25   :  { %94 = vsyncadd [#allocation4], 4294967168 }
  0x26   :  { %42 = vsyncpa [#allocation3], 1 }
  0x27   :  { %43 = vsyncpa [#allocation4], 1 }

</bundles_post_ra>
